<compile_context>
chip_gen: v6e
topology: v6e:2x2x1
jax: 0.10.0
libtpu: 0.0.40
codegen_flags: <defaults>
</compile_context>

<pallas_src>
import functools

import jax
import jax.numpy as jnp
from jax import lax
from jax.experimental import pallas as pl
from jax.experimental.pallas import tpu as pltpu


def _pick_row_tile(H, max_rows=32):
    """Largest multiple-of-8 divisor of H that is <= max_rows (prefer >= 2 blocks)."""
    cands = [t for t in range(8, max_rows + 1, 8) if H % t == 0]
    if not cands:
        return H                      # fall back: whole image height in one block
    small = [t for t in cands if H // t >= 2]
    return max(small) if small else max(cands)


# ----------------------------- Pallas kernel --------------------------------
def repmixer_kernel(x_ref, hal_ref, wl_ref, cl_ref, o_ref, xe_ref, *, Th, Wc, C, K):
    """One (batch, row-block) tile per grid step.

    x_ref  : (1, Th, Wc)     row block of the input, Wc = W*C (lane-dense)
    hal_ref: (1, 1, 2, Wc)   [row above block, row below block] (zeros at borders)
    wl_ref : (K*K, Wc)       lane-expanded folded stencil weights (edge-masked)
    cl_ref : (1, Wc)         lane-expanded folded bias
    o_ref  : (1, Th, Wc)     output row block
    xe_ref : (Th+2, Wc)      VMEM scratch slab: [top halo, block rows, bottom halo]
    """
    pad = K // 2

    # Assemble the (Th+2, Wc) slab so every dy tap is a ref-side row-offset load.
    xe_ref[1:Th + 1, :] = x_ref[0]
    halo = hal_ref[0, 0, :, :]                       # (2, Wc)
    xe_ref[0:1, :] = halo[0:1, :]
    xe_ref[Th + 1:Th + 2, :] = halo[1:2, :]

    acc = jnp.zeros((Th, Wc), jnp.float32)
    for dy in range(K):
        slab = xe_ref[dy:dy + Th, :]                 # static row-offset ref load
        for dx in range(K):
            sh = (dx - pad) * C                      # horizontal shift in lanes
            if sh == 0:
                xs = slab
            else:
                # lane rotate on the XLU; wrapped lanes are killed by the
                # zeroed edge weights folded into wl.
                xs = pltpu.roll(slab, shift=(-sh) % Wc, axis=1)
            w_row = wl_ref[dy * K + dx, :][None, :]  # (1, Wc) f32
            acc = acc + xs * w_row
    o_ref[0] = (acc + cl_ref[...]).astype(o_ref.dtype)


# ------------------------------ wrappers -------------------------------------
def repmixer_forward_nhwc(x_nhwc, w_mix, b_mix, n_scale, n_bias, layer_scale,
                          row_tile=None):
    """x_nhwc: (B, H, W, C). Returns (B, H, W, C)."""
    B, H, W, C = x_nhwc.shape
    K = w_mix.shape[0]
    pad = K // 2
    Wc = W * C
    Th = row_tile if row_tile is not None else _pick_row_tile(H)
    assert H % Th == 0, "row tile must divide H"
    nH = H // Th

    # Lane-dense view: channels fastest within each image row.
    xr = x_nhwc.reshape(B, H, Wc)

    # Row halos: two rows per row-block, zero rows at the image border.
    zrow = jnp.zeros((B, 1, Wc), xr.dtype)
    tops = jnp.concatenate([zrow, xr[:, Th - 1:H - 1:Th, :]], axis=1)   # (B, nH, Wc)
    bots = jnp.concatenate([xr[:, Th:H:Th, :], zrow], axis=1)           # (B, nH, Wc)
    hal = jnp.stack([tops, bots], axis=2)                               # (B, nH, 2, Wc)

    # Fold  out = x + ls*(mixer(x) - norm(x))  into one stencil + bias.
    f32 = jnp.float32
    ls = layer_scale.astype(f32)
    wp = w_mix.astype(f32) * ls[None, None, :]                          # (K, K, C)
    wp = wp.at[pad, pad, :].add(1.0 - ls * n_scale.astype(f32))
    c0 = ls * (b_mix.astype(f32) - n_bias.astype(f32))                  # (C,)

    # Lane expansion to (K*K, W*C) with the horizontal zero-padding mask folded in.
    w_idx = jnp.arange(W)
    rows = []
    for dy in range(K):
        for dx in range(K):
            off = dx - pad
            m = ((w_idx + off >= 0) & (w_idx + off < W)).astype(f32)    # (W,)
            rows.append((m[:, None] * wp[dy, dx][None, :]).reshape(Wc))
    wl = jnp.stack(rows, axis=0)                                        # (K*K, Wc)
    cl = jnp.tile(c0, W).reshape(1, Wc)                                 # (1, Wc)

    kernel = functools.partial(repmixer_kernel, Th=Th, Wc=Wc, C=C, K=K)
    out = pl.pallas_call(
        kernel,
        out_shape=jax.ShapeDtypeStruct((B, H, Wc), x_nhwc.dtype),
        grid_spec=pltpu.PrefetchScalarGridSpec(
            num_scalar_prefetch=0,
            grid=(B, nH),
            in_specs=[
                pl.BlockSpec((1, Th, Wc), lambda b, h: (b, h, 0)),
                pl.BlockSpec((1, 1, 2, Wc), lambda b, h: (b, h, 0, 0)),
                pl.BlockSpec((K * K, Wc), lambda b, h: (0, 0)),
                pl.BlockSpec((1, Wc), lambda b, h: (0, 0)),
            ],
            out_specs=pl.BlockSpec((1, Th, Wc), lambda b, h: (b, h, 0)),
            scratch_shapes=[pltpu.VMEM((Th + 2, Wc), x_nhwc.dtype)],
        ),
        compiler_params=pltpu.CompilerParams(
            dimension_semantics=("parallel", "parallel")),
    )(xr, hal, wl, cl)
    return out.reshape(B, H, W, C)


def repmixer_forward(x_nchw, w_mix, b_mix, n_scale, n_bias, layer_scale):
    """NCHW wrapper matching the PyTorch Conv2d convention."""
    x = jnp.transpose(x_nchw, (0, 2, 3, 1))
    y = repmixer_forward_nhwc(x, w_mix, b_mix, n_scale, n_bias, layer_scale)
    return jnp.transpose(y, (0, 3, 1, 2))


# ----------------------- parameter setup (plain JAX glue) -------------------
def bn_fold(gamma, beta, mean, var, eps=1e-5):
    s = gamma / jnp.sqrt(var + eps)
    return s, beta - mean * s


def init_repmixer_params(key, C, K=3):
    ks = jax.random.split(key, 20)

    # mixer: depthwise KxK conv (no bias) + BN
    w_conv = 0.1 * jax.random.normal(ks[0], (C, 1, K, K), jnp.float32)
    g_c = 1.0 + 0.1 * jax.random.normal(ks[1], (C,), jnp.float32)
    b_c = 0.1 * jax.random.normal(ks[2], (C,), jnp.float32)
    m_c = 0.1 * jax.random.normal(ks[3], (C,), jnp.float32)
    v_c = 0.5 + jnp.abs(jax.random.normal(ks[4], (C,), jnp.float32))

    # mixer: depthwise 1x1 "scale" conv (no bias) + BN
    w_sc = 0.1 * jax.random.normal(ks[5], (C, 1, 1, 1), jnp.float32)
    g_s = 1.0 + 0.1 * jax.random.normal(ks[6], (C,), jnp.float32)
    b_s = 0.1 * jax.random.normal(ks[7], (C,), jnp.float32)
    m_s = 0.1 * jax.random.normal(ks[8], (C,), jnp.float32)
    v_s = 0.5 + jnp.abs(jax.random.normal(ks[9], (C,), jnp.float32))

    # mixer: BN skip branch
    g_k = 1.0 + 0.1 * jax.random.normal(ks[10], (C,), jnp.float32)
    b_k = 0.1 * jax.random.normal(ks[11], (C,), jnp.float32)
    m_k = 0.1 * jax.random.normal(ks[12], (C,), jnp.float32)
    v_k = 0.5 + jnp.abs(jax.random.normal(ks[13], (C,), jnp.float32))

    # norm: BN skip branch only
    g_n = 1.0 + 0.1 * jax.random.normal(ks[14], (C,), jnp.float32)
    b_n = 0.1 * jax.random.normal(ks[15], (C,), jnp.float32)
    m_n = 0.1 * jax.random.normal(ks[16], (C,), jnp.float32)
    v_n = 0.5 + jnp.abs(jax.random.normal(ks[17], (C,), jnp.float32))

    # layer_scale: module init is 1e-5 * ones((C,1,1)); O(1) random values here
    # (deterministic, fixed seed) so the numerical check is meaningful.
    layer_scale = jax.random.uniform(ks[18], (C,), jnp.float32, 0.5, 1.5)

    raw = dict(w_conv=w_conv, g_c=g_c, b_c=b_c, m_c=m_c, v_c=v_c,
               w_sc=w_sc, g_s=g_s, b_s=b_s, m_s=m_s, v_s=v_s,
               g_k=g_k, b_k=b_k, m_k=m_k, v_k=v_k,
               g_n=g_n, b_n=b_n, m_n=m_n, v_n=v_n,
               layer_scale=layer_scale)

    # ---- fold everything into kernel-ready tensors ----
    s_c, bias_c = bn_fold(g_c, b_c, m_c, v_c)
    s_s, bias_s = bn_fold(g_s, b_s, m_s, v_s)
    s_k, bias_k = bn_fold(g_k, b_k, m_k, v_k)
    s_n, bias_n = bn_fold(g_n, b_n, m_n, v_n)

    w_mix_c = w_conv[:, 0, :, :] * s_c[:, None, None]              # (C,K,K)
    center = K // 2
    w_mix_c = w_mix_c.at[:, center, center].add(w_sc[:, 0, 0, 0] * s_s + s_k)
    b_mix = bias_c + bias_s + bias_k

    folded = dict(
        w_mix=jnp.transpose(w_mix_c, (1, 2, 0)),                   # (K,K,C)
        b_mix=b_mix, n_scale=s_n, n_bias=bias_n, layer_scale=layer_scale)
    return raw, folded


# ------------------------- pure-JAX reference (NCHW) ------------------------
def repmixer_reference(x, raw, K=3):
    B, C, H, W = x.shape

    def dwconv(inp, w):
        return lax.conv_general_dilated(
            inp, w, window_strides=(1, 1), padding="SAME",
            dimension_numbers=("NCHW", "OIHW", "NCHW"),
            feature_group_count=C)

    def bn(inp, g, b, m, v, eps=1e-5):
        s = g / jnp.sqrt(v + eps)
        return inp * s[None, :, None, None] + (b - m * s)[None, :, None, None]

    conv_branch = bn(dwconv(x, raw["w_conv"]), raw["g_c"], raw["b_c"],
                     raw["m_c"], raw["v_c"])
    scale_branch = bn(dwconv(x, raw["w_sc"]), raw["g_s"], raw["b_s"],
                      raw["m_s"], raw["v_s"])
    skip_branch = bn(x, raw["g_k"], raw["b_k"], raw["m_k"], raw["v_k"])
    mixer_out = conv_branch + scale_branch + skip_branch

    norm_out = bn(x, raw["g_n"], raw["b_n"], raw["m_n"], raw["v_n"])

    ls = raw["layer_scale"][None, :, None, None]
    return x + ls * (mixer_out - norm_out)


# --------------------------------- main --------------------------------------
if __name__ == "__main__":
    K = 3
    # primary small shape + one shape with >1 row block and lane dim >= 128*k
    for (B, C, H, W) in [(2, 4, 16, 16), (1, 32, 32, 32)]:
        key = jax.random.PRNGKey(0)
        kx, kp = jax.random.split(key)
        x = jax.random.normal(kx, (B, C, H, W), jnp.float32)

        raw, folded = init_repmixer_params(kp, C, K)

        out = repmixer_forward(x, folded["w_mix"], folded["b_mix"],
                               folded["n_scale"], folded["n_bias"],
                               folded["layer_scale"])
        out = jax.block_until_ready(out)

        ref = repmixer_reference(x, raw, K)
        assert out.shape == (B, C, H, W)
        assert jnp.allclose(out, ref, rtol=1e-4, atol=1e-4), (
            f"mismatch vs reference for shape {(B, C, H, W)}")

    print("KERNEL_OK")
</pallas_src>

<mosaic_0001>
module attributes {stable_mosaic.version = 11 : i64} {
  func.func @repmixer_kernel(%arg0: i32, %arg1: i32, %arg2: memref<1x8x64xf32, #tpu.memory_space<vmem>>, %arg3: memref<1x1x2x64xf32, #tpu.memory_space<vmem>>, %arg4: memref<9x64xf32, #tpu.memory_space<vmem>>, %arg5: memref<1x64xf32, #tpu.memory_space<vmem>>, %arg6: memref<1x8x64xf32, #tpu.memory_space<vmem>>, %arg7: memref<10x64xf32, #tpu.memory_space<vmem>>) attributes {dimension_semantics = [#tpu.dimension_semantics<parallel>, #tpu.dimension_semantics<parallel>], iteration_bounds = array<i64: 2, 2>, scalar_prefetch = 0 : i64, scratch_operands = 1 : i64, tpu.core_type = #tpu.core_type<tc>, window_params = [{transform_indices = @transform_0, window_bounds = array<i64: 1, 8, 64>}, {transform_indices = @transform_1, window_bounds = array<i64: 1, 1, 2, 64>}, {pipeline_mode = #tpu.pipeline_mode<synchronous>, transform_indices = @transform_2, window_bounds = array<i64: 9, 64>}, {pipeline_mode = #tpu.pipeline_mode<synchronous>, transform_indices = @transform_3, window_bounds = array<i64: 1, 64>}, {transform_indices = @transform_4, window_bounds = array<i64: 1, 8, 64>}]} {
    %c0 = arith.constant 0 : index
    %c0_0 = arith.constant 0 : index
    %c0_1 = arith.constant 0 : index
    %0 = vector.load %arg2[%c0, %c0_0, %c0_1] : memref<1x8x64xf32, #tpu.memory_space<vmem>>, vector<1x8x64xf32>
    %1 = vector.shape_cast %0 : vector<1x8x64xf32> to vector<8x64xf32>
    %c1 = arith.constant 1 : index
    %c0_2 = arith.constant 0 : index
    %2 = vector.load %arg7[%c1, %c0_2] : memref<10x64xf32, #tpu.memory_space<vmem>>, vector<8x64xf32>
    tpu.vector_store %arg7[%c1, %c0_2], %1 {strides = array<i32>} : memref<10x64xf32, #tpu.memory_space<vmem>>, vector<8x64xf32>,
    %c0_3 = arith.constant 0 : index
    %c0_4 = arith.constant 0 : index
    %c0_5 = arith.constant 0 : index
    %c0_6 = arith.constant 0 : index
    %3 = vector.load %arg3[%c0_3, %c0_4, %c0_5, %c0_6] : memref<1x1x2x64xf32, #tpu.memory_space<vmem>>, vector<1x1x2x64xf32>
    %4 = vector.shape_cast %3 : vector<1x1x2x64xf32> to vector<2x64xf32>
    %5 = vector.extract_strided_slice %4 {offsets = [0, 0], sizes = [1, 64], strides = [1, 1]} : vector<2x64xf32> to vector<1x64xf32>
    %c0_7 = arith.constant 0 : index
    %c0_8 = arith.constant 0 : index
    %6 = vector.load %arg7[%c0_7, %c0_8] : memref<10x64xf32, #tpu.memory_space<vmem>>, vector<1x64xf32>
    tpu.vector_store %arg7[%c0_7, %c0_8], %5 {strides = array<i32>} : memref<10x64xf32, #tpu.memory_space<vmem>>, vector<1x64xf32>,
    %7 = vector.extract_strided_slice %4 {offsets = [1, 0], sizes = [1, 64], strides = [1, 1]} : vector<2x64xf32> to vector<1x64xf32>
    %c9 = arith.constant 9 : index
    %c0_9 = arith.constant 0 : index
    %8 = vector.load %arg7[%c9, %c0_9] : memref<10x64xf32, #tpu.memory_space<vmem>>, vector<1x64xf32>
    tpu.vector_store %arg7[%c9, %c0_9], %7 {strides = array<i32>} : memref<10x64xf32, #tpu.memory_space<vmem>>, vector<1x64xf32>,
    %cst = arith.constant 0.000000e+00 : f32
    %9 = vector.broadcast %cst : f32 to vector<8x64xf32>
    %c0_10 = arith.constant 0 : index
    %c0_11 = arith.constant 0 : index
    %10 = vector.load %arg7[%c0_10, %c0_11] : memref<10x64xf32, #tpu.memory_space<vmem>>, vector<8x64xf32>
    %c4_i32 = arith.constant 4 : i32
    %11 = tpu.dynamic_rotate %10 by %c4_i32 dim 1 : vector<8x64xf32>, i32 -> vector<8x64xf32>
    %c0_12 = arith.constant 0 : index
    %c0_13 = arith.constant 0 : index
    %12 = vector.load %arg4[%c0_12, %c0_13] : memref<9x64xf32, #tpu.memory_space<vmem>>, vector<1x64xf32>
    %13 = vector.shape_cast %12 : vector<1x64xf32> to vector<64xf32>
    %14 = vector.shape_cast %13 : vector<64xf32> to vector<1x64xf32>
    %15 = vector.broadcast %14 : vector<1x64xf32> to vector<8x64xf32>
    %16 = arith.mulf %11, %15 : vector<8x64xf32>
    %17 = arith.addf %9, %16 : vector<8x64xf32>
    %c1_14 = arith.constant 1 : index
    %c0_15 = arith.constant 0 : index
    %18 = vector.load %arg4[%c1_14, %c0_15] : memref<9x64xf32, #tpu.memory_space<vmem>>, vector<1x64xf32>
    %19 = vector.shape_cast %18 : vector<1x64xf32> to vector<64xf32>
    %20 = vector.shape_cast %19 : vector<64xf32> to vector<1x64xf32>
    %21 = vector.broadcast %20 : vector<1x64xf32> to vector<8x64xf32>
    %22 = arith.mulf %10, %21 : vector<8x64xf32>
    %23 = arith.addf %17, %22 : vector<8x64xf32>
    %c60_i32 = arith.constant 60 : i32
    %24 = tpu.dynamic_rotate %10 by %c60_i32 dim 1 : vector<8x64xf32>, i32 -> vector<8x64xf32>
    %c2 = arith.constant 2 : index
    %c0_16 = arith.constant 0 : index
    %25 = vector.load %arg4[%c2, %c0_16] : memref<9x64xf32, #tpu.memory_space<vmem>>, vector<1x64xf32>
    %26 = vector.shape_cast %25 : vector<1x64xf32> to vector<64xf32>
    %27 = vector.shape_cast %26 : vector<64xf32> to vector<1x64xf32>
    %28 = vector.broadcast %27 : vector<1x64xf32> to vector<8x64xf32>
    %29 = arith.mulf %24, %28 : vector<8x64xf32>
    %30 = arith.addf %23, %29 : vector<8x64xf32>
    %c1_17 = arith.constant 1 : index
    %c0_18 = arith.constant 0 : index
    %31 = vector.load %arg7[%c1_17, %c0_18] : memref<10x64xf32, #tpu.memory_space<vmem>>, vector<8x64xf32>
    %c4_i32_19 = arith.constant 4 : i32
    %32 = tpu.dynamic_rotate %31 by %c4_i32_19 dim 1 : vector<8x64xf32>, i32 -> vector<8x64xf32>
    %c3 = arith.constant 3 : index
    %c0_20 = arith.constant 0 : index
    %33 = vector.load %arg4[%c3, %c0_20] : memref<9x64xf32, #tpu.memory_space<vmem>>, vector<1x64xf32>
    %34 = vector.shape_cast %33 : vector<1x64xf32> to vector<64xf32>
    %35 = vector.shape_cast %34 : vector<64xf32> to vector<1x64xf32>
    %36 = vector.broadcast %35 : vector<1x64xf32> to vector<8x64xf32>
    %37 = arith.mulf %32, %36 : vector<8x64xf32>
    %38 = arith.addf %30, %37 : vector<8x64xf32>
    %c4 = arith.constant 4 : index
    %c0_21 = arith.constant 0 : index
    %39 = vector.load %arg4[%c4, %c0_21] : memref<9x64xf32, #tpu.memory_space<vmem>>, vector<1x64xf32>
    %40 = vector.shape_cast %39 : vector<1x64xf32> to vector<64xf32>
    %41 = vector.shape_cast %40 : vector<64xf32> to vector<1x64xf32>
    %42 = vector.broadcast %41 : vector<1x64xf32> to vector<8x64xf32>
    %43 = arith.mulf %31, %42 : vector<8x64xf32>
    %44 = arith.addf %38, %43 : vector<8x64xf32>
    %c60_i32_22 = arith.constant 60 : i32
    %45 = tpu.dynamic_rotate %31 by %c60_i32_22 dim 1 : vector<8x64xf32>, i32 -> vector<8x64xf32>
    %c5 = arith.constant 5 : index
    %c0_23 = arith.constant 0 : index
    %46 = vector.load %arg4[%c5, %c0_23] : memref<9x64xf32, #tpu.memory_space<vmem>>, vector<1x64xf32>
    %47 = vector.shape_cast %46 : vector<1x64xf32> to vector<64xf32>
    %48 = vector.shape_cast %47 : vector<64xf32> to vector<1x64xf32>
    %49 = vector.broadcast %48 : vector<1x64xf32> to vector<8x64xf32>
    %50 = arith.mulf %45, %49 : vector<8x64xf32>
    %51 = arith.addf %44, %50 : vector<8x64xf32>
    %c2_24 = arith.constant 2 : index
    %c0_25 = arith.constant 0 : index
    %52 = vector.load %arg7[%c2_24, %c0_25] : memref<10x64xf32, #tpu.memory_space<vmem>>, vector<8x64xf32>
    %c4_i32_26 = arith.constant 4 : i32
    %53 = tpu.dynamic_rotate %52 by %c4_i32_26 dim 1 : vector<8x64xf32>, i32 -> vector<8x64xf32>
    %c6 = arith.constant 6 : index
    %c0_27 = arith.constant 0 : index
    %54 = vector.load %arg4[%c6, %c0_27] : memref<9x64xf32, #tpu.memory_space<vmem>>, vector<1x64xf32>
    %55 = vector.shape_cast %54 : vector<1x64xf32> to vector<64xf32>
    %56 = vector.shape_cast %55 : vector<64xf32> to vector<1x64xf32>
    %57 = vector.broadcast %56 : vector<1x64xf32> to vector<8x64xf32>
    %58 = arith.mulf %53, %57 : vector<8x64xf32>
    %59 = arith.addf %51, %58 : vector<8x64xf32>
    %c7 = arith.constant 7 : index
    %c0_28 = arith.constant 0 : index
    %60 = vector.load %arg4[%c7, %c0_28] : memref<9x64xf32, #tpu.memory_space<vmem>>, vector<1x64xf32>
    %61 = vector.shape_cast %60 : vector<1x64xf32> to vector<64xf32>
    %62 = vector.shape_cast %61 : vector<64xf32> to vector<1x64xf32>
    %63 = vector.broadcast %62 : vector<1x64xf32> to vector<8x64xf32>
    %64 = arith.mulf %52, %63 : vector<8x64xf32>
    %65 = arith.addf %59, %64 : vector<8x64xf32>
    %c60_i32_29 = arith.constant 60 : i32
    %66 = tpu.dynamic_rotate %52 by %c60_i32_29 dim 1 : vector<8x64xf32>, i32 -> vector<8x64xf32>
    %c8 = arith.constant 8 : index
    %c0_30 = arith.constant 0 : index
    %67 = vector.load %arg4[%c8, %c0_30] : memref<9x64xf32, #tpu.memory_space<vmem>>, vector<1x64xf32>
    %68 = vector.shape_cast %67 : vector<1x64xf32> to vector<64xf32>
    %69 = vector.shape_cast %68 : vector<64xf32> to vector<1x64xf32>
    %70 = vector.broadcast %69 : vector<1x64xf32> to vector<8x64xf32>
    %71 = arith.mulf %66, %70 : vector<8x64xf32>
    %72 = arith.addf %65, %71 : vector<8x64xf32>
    %c0_31 = arith.constant 0 : index
    %c0_32 = arith.constant 0 : index
    %73 = vector.load %arg5[%c0_31, %c0_32] : memref<1x64xf32, #tpu.memory_space<vmem>>, vector<1x64xf32>
    %74 = vector.broadcast %73 : vector<1x64xf32> to vector<8x64xf32>
    %75 = arith.addf %72, %74 : vector<8x64xf32>
    %c0_33 = arith.constant 0 : index
    %c0_34 = arith.constant 0 : index
    %c0_35 = arith.constant 0 : index
    %76 = vector.load %arg6[%c0_33, %c0_34, %c0_35] : memref<1x8x64xf32, #tpu.memory_space<vmem>>, vector<1x8x64xf32>
    %77 = vector.shape_cast %76 : vector<1x8x64xf32> to vector<8x64xf32>
    %78 = vector.shape_cast %75 : vector<8x64xf32> to vector<1x8x64xf32>
    tpu.vector_store %arg6[%c0_33, %c0_34, %c0_35], %78 {strides = array<i32>} : memref<1x8x64xf32, #tpu.memory_space<vmem>>, vector<1x8x64xf32>,
    return
  }
  func.func @transform_0(%arg0: i32, %arg1: i32) -> (i32, i32, i32) {
    %c0_i32 = arith.constant 0 : i32
    %c0_i32_0 = arith.constant 0 : i32
    return %arg0, %arg1, %c0_i32 : i32, i32, i32
  }
  func.func @transform_1(%arg0: i32, %arg1: i32) -> (i32, i32, i32, i32) {
    %c0_i32 = arith.constant 0 : i32
    %c0_i32_0 = arith.constant 0 : i32
    %c0_i32_1 = arith.constant 0 : i32
    return %arg0, %arg1, %c0_i32, %c0_i32_0 : i32, i32, i32, i32
  }
  func.func @transform_2(%arg0: i32, %arg1: i32) -> (i32, i32) {
    %c0_i32 = arith.constant 0 : i32
    %c0_i32_0 = arith.constant 0 : i32
    %c0_i32_1 = arith.constant 0 : i32
    return %c0_i32, %c0_i32_0 : i32, i32
  }
  func.func @transform_3(%arg0: i32, %arg1: i32) -> (i32, i32) {
    %c0_i32 = arith.constant 0 : i32
    %c0_i32_0 = arith.constant 0 : i32
    %c0_i32_1 = arith.constant 0 : i32
    return %c0_i32, %c0_i32_0 : i32, i32
  }
  func.func @transform_4(%arg0: i32, %arg1: i32) -> (i32, i32, i32) {
    %c0_i32 = arith.constant 0 : i32
    %c0_i32_0 = arith.constant 0 : i32
    return %arg0, %arg1, %c0_i32 : i32, i32, i32
  }
}

</mosaic_0001>

<bundles_post_ra>
// kernel: tpu_custom_call.1
= control target key start
LH: loop header
LB: loop body
LE: loop exit
PB: predicated region body
PF: predicated region fallthrough
CT: control target
= control target key end

     0   :  { %s1163_s0 = inlined_call_operand.hbm [shape: f32[2,16,64], index: 0, kind: input, shape index: {}]   ;;  %s1164_s1 = inlined_call_operand.hbm [shape: f32[2,2,2,64], index: 1, kind: input, shape index: {}]   ;;  %s1165_s2 = inlined_call_operand.hbm [shape: f32[9,64], index: 2, kind: input, shape index: {}]   ;;  %s1166_s3 = inlined_call_operand.vmem [shape: f32[1,64], index: 3, kind: input, shape index: {}]   ;;  %s1167_s4 = inlined_call_operand.hbm [shape: f32[2,16,64], index: 4, kind: output, shape index: {}]  }
   0x1   :  { %1175 = sst [smem:[#allocation19_spill]] %s1163_s0 }
   0x2   :  { %1176 = sst [smem:[#allocation20_spill]] %s1165_s2 }
   0x3   :  { %1177 = sst [smem:[#allocation21_spill]] %s1167_s4 }
   0x4   :  { %9 = vsyncpa [#allocation4], 0 }
   0x5   :  { %11 = vsyncpa [#allocation4 + $0x1], 0 }
   0x6   :  { %12 = vsyncpa [#allocation7], 0 }
   0x7   :  { %14 = vsyncpa [#allocation7 + $0x1], 0 }
   0x8   :  { %15 = vsyncpa [#allocation5], 0 }
   0x9   :  { %17 = vsyncpa [#allocation5 + $0x1], 0  ;;  %s933_s15 = smov 0   ;;  %s935_s16 = smov 0  }
   0xa   :  { %s937_s17 = smov 0   ;;  %s939_s18 = smov 0  }
   0xb   :  { %s941_s19 = smov 0   ;;  %s943_s20 = smov 0  }
   0xc   :  { %s945_s21 = smov 0   ;;  %s947_s22 = smov 0  }
   0xd LB: > { %1178 = sst [smem:[#allocation14_spill]] %s867_s15  ;;  %s974_s23 = sadd.s32 4294967295, %s895_s22   ;;  %s895_s22 = sphi %s947_s22, %s23_s22   ;;  %s891_s21 = sphi %s945_s21, %s1205_s21   ;;  %s887_s20 = sphi %s943_s20, %s1204_s20   ;;  %s883_s19 = sphi %s941_s19, %s1203_s19   ;;  %s879_s18 = sphi %s939_s18, %s1202_s18   ;;  %s875_s17 = sphi %s937_s17, %s1201_s17   ;;  %s871_s16 = sphi %s935_s16, %s1200_s16   ;;  %s867_s15 = sphi %s933_s15, %s1199_s15  }
   0xe   : > { %s578_s24 = sadd.s32 4294967294, %s895_s22   ;;  %p57_p0 = scmp.ne.s32.totalorder %s871_s16, %s867_s15 }
   0xf   : > { %p58_p1 = scmp.eq.s32.totalorder %s974_s23, 0  ;;  %p159_p3 = scmp.eq.s32.totalorder %s578_s24, 3 }
  0x10   : > { %p579_p5 = scmp.ge.s32.totalorder %s895_s22, 1  ;;  %p166_p7 = scmp.lt.s32.totalorder %s895_s22, 5 }
  0x11   : > { %p983_p4 = por %p58_p1, %p57_p0  ;;  %p988_p6 = por %p159_p3, %p57_p0 }
  0x12   : > { %p993_p8 = pnand %p579_p5, %p166_p7  ;;  %s897_s28 = smov [#allocation8]  }
  0x13   : > { %s1180_s26 = scalar_select %p988_p6, 1, 0 }
  0x14   : > { %s178_s29 = sshll.u32 %s897_s28, 4  ;;  %p618_p9 = pneg %p993_p8  ;;  %s179_s29 = int_to_ptr.vmem [resolvable:$true] %s178_s29 }
  0x15   : > { %1181 = sst [smem:[#allocation15_spill]] %s1180_s26  ;;  %s720_s30 = scalar_lea.vmem %s179_s29, 256 }
  0x16   : > { %p619_p10 = pnand %p618_p9, %p58_p1  ;;  %p721_p12 = scmp.ne.s32.totalorder %s179_s29, %s720_s30 }
  0x17   : > { %p728_p3 = scmp.lt.s32.totalorder %s179_s29, %s179_s29  ;;  %p729_p2 = scmp.lt.s32.totalorder %s720_s30, %s720_s30 }
  0x18   : > { %p711_p11 = pneg %p619_p10 }
  0x19   : > { %p730_p6 = por %p729_p2, %p728_p3 }
  0x1a   : > { %p723_p13 = pnand %p721_p12, %p711_p11 }
  0x1c   : > { %p724_p0 = pneg %p723_p13 }
  0x1e   : > { %p731_p5 = pnand %p730_p6, %p724_p0 }
  0x20   : > { %734 = shalt.err (!%p731_p5)
}
  0x21   : > { %s898_s5 = smov 128   ;;  %s899_s6 = smov 8  }
  0x22   : > { %s1183_s2 = sld [smem:[#allocation20_spill]]  ;;  %s32_s9 = sadd.s32 1, %s887_s20 }
  0x23   : > { %p33_p2 = scmp.ge.s32.totalorder %s32_s9, 2  ;;  %s35_s10 = sadd.s32 1, %s891_s21 }
  0x24   : > { %s44_s11 = sadd.s32 1, %s875_s17  ;;  %p51_p6 = scmp.ne.s32.totalorder %s875_s17, %s871_s16 }
  0x25   : > { %s1207_s9 = smov (%p33_p2, %s32_s9), 0  ;;  %s1209_s10 = smov (!%p33_p2, %s35_s10), %s891_s21 }
  0x26   : > { %1184 = sst [smem:[#allocation16_spill]] %s1207_s9  ;;  %s40_s12 = ssub.s32 %s887_s20, %s1207_s9 }
  0x27   : > { %p52_p7 = scmp.eq.s32.totalorder %s895_s22, 0  ;;  %p37_p9 = scmp.ge.s32.totalorder %s1209_s10, 2 }
  0x28   : > { %621 = dma.hbm_to_vmem [thread:$0]  (!%p619_p10), %s1183_s2, 256, %s179_s29, [#allocation7], %s898_s5, %s898_s5, %s899_s6  }
  0x29   : > { %p1185_p11 = scmp.eq.s32.totalorder %s974_s23, 3  ;;  %p1021_p10 = por %p52_p7, %p51_p6 }
  0x2a   : > { %p634_p13 = scmp.lt.s32.totalorder %s895_s22, 4  ;;  %s1211_s10 = smov (%p37_p9, %s1209_s10), 0 }
  0x2b   : > { %p1017_p12 = por %p1185_p11, %p51_p6  ;;  %1189 = sst [smem:[#allocation18_spill]] %s1211_s10 }
  0x2c   : > { %s1029_s24 = sand.u32 1, %s875_s17   ;;  %s583_s28 = sshll.u32 %s891_s21, 1 }
  0x2d   : > { %s1186_s13 = scalar_select %p1017_p12, 1, 0 }
  0x2e   : > { %s39_s29 = ssub.s32 %s891_s21, %s1211_s10  ;;  %s582_s5 = sshll.u32 %s1029_s24, 3 }
  0x2f   : > { %1187 = sst [smem:[#allocation17_spill]] %s1186_s13  ;;  %s41_s30 = sor.u32 %s40_s12, %s39_s29 }
  0x30   : > { %p42_p0 = scmp.eq.s32.totalorder %s41_s30, 0  ;;  %s204_s6 = sadd.s32 %s887_s20, %s583_s28 }
  0x31   : > { %s199_s7 = scalar_lea.vmem [#allocation3], %s582_s5  ;;  %s584_s9 = sshll.u32 %s204_s6, 7 }
  0x32   : > { %s208_s8 = sshll.u32 %s199_s7, 4  ;;  %s1190_s0 = sld [smem:[#allocation19_spill]]  ;;  %s209_s8 = int_to_ptr.vmem [resolvable:$true] %s208_s8 }
  0x33   : > { %s1037_s2 = scalar_select %p42_p0, %s875_s17, %s44_s11  }
  0x34   : > { %p1046_p3 = pnand %p634_p13, %p1021_p10  ;;  %s215_s12 = sand.u32 1, %s895_s22  }
  0x35   : > { %s587_s28 = sshll.u32 %s204_s6, 5  ;;  %s196_s29 = scalar_lea.sflag [#allocation4], %s1029_s24 }
  0x36   : > { %p737_p5 = pneg %p1046_p3  ;;  %s748_s11 = scalar_lea.vmem %s209_s8, 128 }
  0x37   : > { %p749_p2 = scmp.ne.s32.totalorder %s209_s8, %s748_s11  ;;  %s900_s15 = smov [#allocation3]  }
  0x38   : > { %s206_s4 = scalar_lea.hbm %s1190_s0, %s584_s9  ;;  %s753_s26 = sshll.u32 %s900_s15, 4  ;;  %s754_s26 = int_to_ptr.vmem [resolvable:$false] %s753_s26 }
  0x39   : > { %p751_p6 = pnand %p749_p2, %p737_p5  ;;  %s755_s9 = scalar_lea.vmem %s754_s26, 256 }
  0x3a   : > { %p756_p9 = scmp.lt.s32.totalorder %s209_s8, %s754_s26  ;;  %p757_p11 = scmp.lt.s32.totalorder %s755_s9, %s748_s11 }
  0x3b   : > { %p752_p7 = pneg %p751_p6 }
  0x3c   : > { %p758_p10 = por %p757_p11, %p756_p9 }
  0x3e   : > { %p759_p13 = pnand %p758_p10, %p752_p7 }
  0x40   : > { %762 = shalt.err (!%p759_p13)
}
  0x41   : > { %625 = dma.hbm_to_vmem [thread:$0]  (!%p1046_p3), %s206_s4, 128, %s209_s8, %s196_s29  }
  0x42   : > { %s585_s14 = sshll.u32 %s1029_s24, 1  ;;  %s226_s6 = scalar_lea.hbm %s1164_s1, %s587_s28 }
  0x43   : > { %s219_s7 = scalar_lea.vmem [#allocation6], %s585_s14  ;;  %s216_s15 = scalar_lea.sflag [#allocation7], %s215_s12 }
  0x44   : > { %s228_s0 = sshll.u32 %s219_s7, 4  ;;  %s901_s11 = smov [#allocation6]   ;;  %s229_s0 = int_to_ptr.vmem [resolvable:$true] %s228_s0 }
  0x45   : > { %s776_s10 = scalar_lea.vmem %s229_s0, 32  ;;  %s781_s26 = sshll.u32 %s901_s11, 4  ;;  %s782_s26 = int_to_ptr.vmem [resolvable:$false] %s781_s26 }
  0x46   : > { %p777_p0 = scmp.ne.s32.totalorder %s229_s0, %s776_s10  ;;  %s783_s9 = scalar_lea.vmem %s782_s26, 64 }
  0x47   : > { %p784_p7 = scmp.lt.s32.totalorder %s229_s0, %s782_s26  ;;  %p785_p9 = scmp.lt.s32.totalorder %s783_s9, %s776_s10 }
  0x48   : > { %p779_p2 = pnand %p777_p0, %p737_p5 }
  0x49   : > { %p786_p11 = por %p785_p9, %p784_p7 }
  0x4a   : > { %p780_p6 = pneg %p779_p2 }
  0x4c   : > { %p787_p10 = pnand %p786_p11, %p780_p6 }
  0x4e   : > { %790 = shalt.err (!%p787_p10)
}
  0x4f   : > { %628 = dma.hbm_to_vmem [thread:$0]  (!%p1046_p3), %s226_s6, 32, %s229_s0, %s216_s15  }
  0x50   : > { %237 = sbr.rel (%p993_p8) target bundleno = 596 (0x254), region = 36  ;;  %s1071_s4 = sand.u32 (!%p993_p8), 1, %s871_s16  }
  0x51   : > { %s589_s24 = sshll.u32 (!%p993_p8), %s1071_s4, 3  ;;  %s240_s8 = scalar_lea.sflag (!%p993_p8), [#allocation4], %s1071_s4 }
  0x52   : > { %s243_s10 = scalar_lea.vmem (!%p993_p8), [#allocation3], %s589_s24 }
  0x55   : > { %850 = dma.done.wait (%p983_p4), %s240_s8, 128  }
  0x56   : > { %852 = vsyncadd (%p983_p4), %s240_s8, 4294967168  ;;  %s248_s0 = sand.u32 1, %s974_s23   ;;  %s590_s27 = sshll.u32 %s1071_s4, 1 }
  0x57   : > { %s249_s13 = scalar_lea.sflag [#allocation7], %s248_s0  ;;  %s252_s12 = scalar_lea.vmem [#allocation6], %s590_s27 }
  0x58   : > { %854 = dma.done.wait (%p983_p4), %s249_s13, 32  }
  0x59   : > { %856 = vsyncadd (%p983_p4), %s249_s13, 4294967264 }
  0x5a   : > { %858 = dma.done.wait (%p58_p1), [#allocation7], 256  }
  0x5b   : > { %860 = vsyncadd (%p58_p1), [#allocation7], 4294967040  ;;  %vm287_vm0 = vcmask 523264   ;;  %vm290_vm1 = vcmask 516096   ;;  %vm292_vm2 = vcmask 517121   ;;  %v286_v0 = vld [vmem:[%s243_s10] sm:$0xff] }
  0x5c   : > { %v289_v1 = vld [vmem:[%s252_s12] sm:$0x3]  ;;  %288 = vst.msk [vmem:[#allocation2 + $0x1] sm:$0xff] %vm287_vm0, %v286_v0  ;;  %s902_s28 = smov 64   ;;  %v595_v5 = vld [vmem:[#allocation8 + $0x2] ss:$0 sm:$0xff] }
  0x5d   : > { %291 = vst.msk [vmem:[#allocation2] sm:$0x1] %vm290_vm1, %v289_v1  ;;  %s903_s25 = smov 4   ;;  %v598_v6 = vld [vmem:[#allocation8 + $0x5] ss:$0 sm:$0xff]  ;;  %s904_s23 = smov 60  }
  0x5e   : > { %293 = vst.msk [vmem:[#allocation2 + $0x8] sm:$0x2] %vm292_vm2, %v289_v1  ;;  %v601_v7 = vld [vmem:[#allocation8 + $0x8] ss:$0 sm:$0xff]  ;;  %v594_v8 = vld [vmem:[#allocation8 + $0x1] ss:$0 sm:$0xff] }
  0x5f   : > { %v596_v10 = vld [vmem:[#allocation8 + $0x3] ss:$0 sm:$0xff]  ;;  %vm295_vm3 = vcmask 1048064   ;;  %v593_v17 = vld [vmem:[#allocation8] ss:$0 sm:$0xff]  ;;  %s905_s29 = smov 56  }
  0x60   : > { %v597_v21 = vld [vmem:[#allocation8 + $0x4] ss:$0 sm:$0xff]  ;;  %v600_v27 = vld [vmem:[#allocation8 + $0x7] ss:$0 sm:$0xff]  ;;  %v599_v32 = vld [vmem:[#allocation8 + $0x6] ss:$0 sm:$0xff] }
  0x61   : > { %v602_v35 = vld [vmem:[%s1166_s3] ss:$0 sm:$0xff]  ;;  %s906_s6 = smov 68   ;;  %s604_s7 = sshll.u32 %s883_s19, 1 }
  0x62   : > { %s454_s15 = sadd.s32 %s879_s18, %s604_s7  ;;  %s285_s26 = scalar_lea.vmem [#allocation9], %s589_s24 }
  0x63   : > { %v339_v4 = vld [vmem:[#allocation2 + $0x1] sm:$0xff]  ;;  %s605_s11 = sshll.u32 %s454_s15, 7  ;;  %s458_s9 = sshll.u32 %s285_s26, 4  ;;  %s459_s9 = int_to_ptr.vmem [resolvable:$true] %s458_s9 }
  0x64   : > { %v294_v2 = vld [vmem:[#allocation2] sm:$0xff]  ;;  %v362_v24 = vmul.f32 %v597_v21, %v339_v4  ;;  %s1193_s0 = sld [smem:[#allocation21_spill]]  ;;  %s443_s13 = scalar_lea.sflag [#allocation5], %s1071_s4 }
  0x65   : > { %v383_v3 = vld [vmem:[#allocation2 + $0x2] sm:$0xff]  ;;  %296 = vrot.lane.b32.xlu0 %v294_v2, %s902_s28  ;;  %v318_v9 = vmul.f32 %v594_v8, %v294_v2  ;;  %s791_s12 = scalar_lea.vmem %s459_s9, 128  ;;  %s907_s18 = smov [#allocation9]  }
  0x66   : > { %384 = vrot.lane.b32.xlu1 %v383_v3, %s902_s28  ;;  %v406_v30 = vmul.f32 %v600_v27, %v383_v3  ;;  %p792_p1 = scmp.ne.s32.totalorder %s459_s9, %s791_s12  ;;  %s795_s19 = sshll.u32 %s907_s18, 4  ;;  %s796_s19 = int_to_ptr.vmem [resolvable:$false] %s795_s19 }
  0x67   : > { %s797_s24 = scalar_lea.vmem %s796_s19, 256  ;;  %p798_p3 = scmp.lt.s32.totalorder %s459_s9, %s796_s19 }
  0x68   : > { %p793_p4 = pnand %p792_p1, %p1017_p12  ;;  %p799_p5 = scmp.lt.s32.totalorder %s797_s24, %s791_s12 }
  0x69   : > { %340 = vrot.lane.b32.xlu0 %v339_v4, %s902_s28 }
  0x6a   : > { %s1115_s27 = scalar_lea.hbm %s1193_s0, %s605_s11  ;;  %p794_p8 = pneg %p793_p4 }
  0x6b   : > { %p800_p13 = por %p799_p5, %p798_p3 }
  0x6d   : > { %330 = vrot.lane.b32.xlu0 %v595_v5, %s903_s25  ;;  %p801_p0 = pnand %p800_p13, %p794_p8 }
  0x71   : > { %374 = vrot.lane.b32.xlu0 %v598_v6, %s903_s25 }
  0x75   : > { %418 = vrot.lane.b32.xlu0 %v601_v7, %s903_s25 }
  0x79   : > { %320 = vrot.lane.b32.xlu0 %v318_v9, %s904_s23 }
  0x7d   : > { %352 = vrot.lane.b32.xlu0 %v596_v10, %s904_s23 }
  0xd7   : > { %v297_v11 = vpop.permute.xlu0 %296 }
  0xd8   : > { %v298_v12 = vsel %vm295_vm3, %v297_v11, %v294_v2  ;;  %v385_v14 = vpop.permute.xlu1 %384 }
  0xd9   : > { %299 = vrot.lane.b32.xlu1 %v298_v12, %s902_s28  ;;  %v386_v16 = vsel %vm295_vm3, %v385_v14, %v383_v3 }
  0xdb   : > { %v341_v13 = vpop.permute.xlu0 %340 }
  0xdc   : > { %v342_v15 = vsel %vm295_vm3, %v341_v13, %v339_v4 }
  0xdd   : > { %343 = vrot.lane.b32.xlu1 %v342_v15, %s902_s28 }
  0xdf   : > { %v331_v18 = vpop.permute.xlu0 %330 }
  0xe1   : > { %387 = vrot.lane.b32.xlu1 %v386_v16, %s902_s28 }
  0xe3   : > { %v375_v25 = vpop.permute.xlu0 %374 }
  0xe5   : > { %308 = vrot.lane.b32.xlu1 %v593_v17, %s904_s23 }
  0xe7   : > { %v419_v33 = vpop.permute.xlu0 %418 }
  0xeb   : > { %v321_v36 = vpop.permute.xlu0 %320 }
  0xef   : > { %v353_v39 = vpop.permute.xlu0 %352 }
 0x14b   : > { %v300_v19 = vpop.permute.xlu1 %299 }
 0x14c   : > { %v301_v20 = vsel %vm295_vm3, %v300_v19, %v294_v2 }
 0x14d   : > { %v333_v22 = vmul.f32 %v331_v18, %v301_v20 }
 0x14f   : > { %v344_v23 = vpop.permute.xlu1 %343  ;;  %335 = vrot.lane.b32.xlu1 %v333_v22, %s905_s29 }
 0x150   : > { %v345_v26 = vsel %vm295_vm3, %v344_v23, %v339_v4 }
 0x151   : > { %v377_v28 = vmul.f32 %v375_v25, %v345_v26  ;;  %v355_v42 = vmul.f32 %v353_v39, %v345_v26 }
 0x153   : > { %v388_v29 = vpop.permute.xlu1 %387  ;;  %364 = vrot.lane.b32.xlu1 %v362_v24, %s904_s23  ;;  %379 = vrot.lane.b32.xlu0 %v377_v28, %s905_s29 }
 0x154   : > { %v389_v31 = vsel %vm295_vm3, %v388_v29, %v383_v3 }
 0x155   : > { %v421_v34 = vmul.f32 %v419_v33, %v389_v31 }
 0x157   : > { %396 = vrot.lane.b32.xlu1 %v599_v32, %s904_s23  ;;  %408 = vrot.lane.b32.xlu0 %v406_v30, %s904_s23  ;;  %v309_v37 = vpop.permute.xlu1 %308 }
 0x158   : > { %v311_v38 = vmul.f32 %v309_v37, %v301_v20 }
 0x15a   : > { %v323_v40 = vadd.f32 %v321_v36, %v311_v38 }
 0x15b   : > { %423 = vrot.lane.b32.xlu1 %v421_v34, %s905_s29  ;;  %433 = vrot.lane.b32.xlu0 %v602_v35, %s904_s23 }
 0x1c1   : > { %v336_v41 = vpop.permute.xlu1 %335 }
 0x1c2   : > { %v338_v43 = vadd.f32 %v336_v41, %v323_v40 }
 0x1c4   : > { %v356_v44 = vadd.f32 %v355_v42, %v338_v43 }
 0x1c5   : > { %v365_v45 = vpop.permute.xlu1 %364  ;;  %v380_v46 = vpop.permute.xlu0 %379 }
 0x1c6   : > { %v367_v47 = vadd.f32 %v365_v45, %v356_v44 }
 0x1c8   : > { %v382_v50 = vadd.f32 %v380_v46, %v367_v47 }
 0x1c9   : > { %v397_v48 = vpop.permute.xlu1 %396  ;;  %v409_v49 = vpop.permute.xlu0 %408 }
 0x1ca   : > { %v399_v51 = vmul.f32 %v397_v48, %v389_v31 }
 0x1cc   : > { %v400_v52 = vadd.f32 %v399_v51, %v382_v50 }
 0x1cd   : > { %v424_v53 = vpop.permute.xlu1 %423  ;;  %v434_v55 = vpop.permute.xlu0 %433 }
 0x1ce   : > { %v411_v54 = vadd.f32 %v409_v49, %v400_v52 }
 0x1d0   : > { %v426_v56 = vadd.f32 %v424_v53, %v411_v54 }
 0x1d2   : > { %v436_v57 = vadd.f32 %v434_v55, %v426_v56 }
 0x1d4   : > { %438 = vrot.lane.b32.xlu1 %v436_v57, %s906_s6 }
 0x246   : > { %v439_v58 = vpop.permute.xlu1 %438 }
 0x247   : > { %441 = vst.msk [vmem:[%s285_s26] sm:$0xff] %vm287_vm0, %v439_v58 }
 0x248   : > { %804 = shalt.err (!%p801_p0)
}
 0x249   : > { %s805_s28 = scalar_lea.hbm %s1115_s27, 128  ;;  %s809_s23 = scalar_lea.hbm %s1193_s0, 512 }
 0x24a   : > { %p806_p2 = scmp.ne.s32.totalorder %s1115_s27, %s805_s28  ;;  %p810_p9 = scmp.lt.s32.totalorder %s1115_s27, %s1193_s0 }
 0x24b   : > { %p811_p11 = scmp.lt.s32.totalorder %s809_s23, %s805_s28 }
 0x24c   : > { %p807_p6 = pnand %p806_p2, %p1017_p12 }
 0x24d   : > { %p812_p10 = por %p811_p11, %p810_p9 }
 0x24e   : > { %p808_p7 = pneg %p807_p6 }
 0x250   : > { %p813_p1 = pnand %p812_p10, %p808_p7 }
 0x252   : > { %816 = shalt.err (!%p813_p1)
}
 0x253   : > { %616 = dma.vmem_to_hbm [thread:$0]  (%p1017_p12), %s459_s9, 128, %s1115_s27, %s443_s13  }
 0x254 PF: > { %s1194_s30 = sld [smem:[#allocation14_spill]]  ;;  %p636_p4 = scmp.ge.s32.totalorder %s895_s22, 2 }
 0x255   : > { %s1195_s6 = sld [smem:[#allocation15_spill]] }
 0x25a   : > { %s470_s7 = sand.u32 1, %s1194_s30  }
 0x25b   : > { %p1196_p8 = scmp.ne.s32.totalorder %s1195_s6, 0  ;;  %s471_s15 = scalar_lea.sflag [#allocation5], %s470_s7 }
 0x25d   : > { %p630_p3 = pnand %p636_p4, %p1196_p8 }
 0x25f   : > { %p631_p5 = pneg %p630_p3 }
 0x261   : > { %862 = dma.done.wait (%p631_p5), %s471_s15, 128  }
 0x262   : > { %864 = vsyncadd (%p631_p5), %s471_s15, 4294967168  ;;  %s23_s22 = sadd.s32 1, %s895_s22   ;;  %s1197_s5 = sld [smem:[#allocation16_spill]] }
 0x263   : > { %p20_p13 = scmp.ge.s32.totalorder %s23_s22, 6   ;;  %s1198_s11 = sld [smem:[#allocation18_spill]] }
 0x264   : > { %s1199_s15 = smov %s871_s16  ;;  %s1200_s16 = smov %s875_s17 }
 0x265   : > { %s1201_s17 = smov %s1037_s2  ;;  %s1202_s18 = smov %s887_s20 }
 0x266   : > { %s1203_s19 = smov %s891_s21  ;;  %22 = sbr.rel (!%p20_p13) target bundleno = 13 (0xd), region = 98 }
 0x268   : > { %s1204_s20 = smov %s1197_s5 }
 0x269   : > { %s1205_s21 = smov %s1198_s11 }
 0x26b   :  { %476 = vsyncpa [#allocation4], 1 }
 0x26c   :  { %478 = vsyncpa [#allocation4 + $0x1], 1 }
 0x26d   :  { %479 = vsyncpa [#allocation7], 1 }
 0x26e   :  { %481 = vsyncpa [#allocation7 + $0x1], 1 }
 0x26f   :  { %482 = vsyncpa [#allocation5], 1 }
 0x270   :  { %484 = vsyncpa [#allocation5 + $0x1], 1 }

</bundles_post_ra>
